<compile_context>
chip_gen: v6e
topology: v6e:2x2x1
jax: 0.10.0
libtpu: 0.0.40
codegen_flags: <defaults>
</compile_context>

<pallas_src>
import functools

import jax
import jax.numpy as jnp
from jax import lax
from jax.experimental import pallas as pl
from jax.experimental.pallas import tpu as pltpu


def _inv_attn_kernel(hidden_ref, items_ref, wq_ref, wk_ref, wv_ref, out_ref,
                     *, normalizer):
    hidden = hidden_ref[...]        # (B, H)
    items = items_ref[...]          # (B, N, E)
    wq = wq_ref[...]                # (K, H)  -- PyTorch Linear (out, in) layout
    wk = wk_ref[...]                # (K, E)
    wv = wv_ref[...]                # (1, E)

    # query = hidden @ wq.T, contracting on axis 1 of both operands so no
    # in-kernel transpose is needed before feeding the MXU.        -> (B, K)
    query = lax.dot_general(
        hidden, wq,
        dimension_numbers=(((1,), (1,)), ((), ())),
        preferred_element_type=jnp.float32)

    # s_be = sum_k query_bk * wk_ke  -> (B, E).  Mathematically,
    #   einsum('bk,bnk->bn', query, items @ wk.T) == einsum('bne,be->bn', items, s)
    # so the (B, N, K) key never needs to exist.
    s = lax.dot_general(
        query, wk,
        dimension_numbers=(((1,), (0,)), ((), ())),
        preferred_element_type=jnp.float32)
    # Fold the 1/sqrt(key_dim) normalizer into s: smallest tensor that is off
    # the final store path.
    s = s * normalizer

    # weight / val as VPU broadcast-multiplies + XLU lane reductions over E.
    weight = jnp.sum(items * s[:, None, :], axis=-1)               # (B, N)
    val = jnp.sum(items * wv, axis=-1)                             # (B, N)
    # (wv is (1, E); numpy broadcasting aligns it as (1, 1, E).)

    out_ref[...] = (weight * val).astype(out_ref.dtype)


def inv_attn(hidden, items_emb, wq, wk, wv, key_dim=None):
    """InvAttn forward: hidden (B, H), items_emb (B, N, E) -> (B, N)."""
    B, H = hidden.shape
    Bi, N, E = items_emb.shape
    assert Bi == B
    K = wq.shape[0]
    assert wq.shape == (K, H)
    assert wk.shape == (K, E)
    assert wv.shape == (1, E)
    if key_dim is None:
        key_dim = K
    assert key_dim == K, "normalizer key_dim must equal the query/key width"
    normalizer = float(key_dim) ** -0.5

    kernel = functools.partial(_inv_attn_kernel, normalizer=normalizer)

    vmem = pltpu.MemorySpace.VMEM
    out = pl.pallas_call(
        kernel,
        out_shape=jax.ShapeDtypeStruct((B, N), jnp.float32),
        # No grid: the whole problem fits comfortably in VMEM, so skip the
        # 1-step grid's pipeline prologue/epilogue and double-buffering.
        in_specs=[
            pl.BlockSpec(memory_space=vmem),   # hidden    (B, H)
            pl.BlockSpec(memory_space=vmem),   # items_emb (B, N, E)
            pl.BlockSpec(memory_space=vmem),   # wq        (K, H)
            pl.BlockSpec(memory_space=vmem),   # wk        (K, E)
            pl.BlockSpec(memory_space=vmem),   # wv        (1, E)
        ],
        out_specs=pl.BlockSpec(memory_space=vmem),
    )(hidden, items_emb, wq, wk, wv)
    # TODO(synk): for production-scale N, add a grid over item rows (marked
    # "parallel" for megacore), size tiles against the 32 MiB scoped-VMEM
    # default, make the (B, N) output tile lane-dense (128-multiple of N), and
    # cast the matmul operands to bf16 on v6e/v7x; the tiny eval shapes need
    # none of that.
    return out


def _reference(hidden, items_emb, wq, wk, wv, key_dim):
    # Same contraction order as the PyTorch module.
    query = hidden @ wq.T
    key = jnp.einsum('bne,ke->bnk', items_emb, wk)
    val = jnp.einsum('bne,e->bn', items_emb, wv[0])
    weight = jnp.einsum('bk,bnk->bn', query, key) * (float(key_dim) ** -0.5)
    return weight * val


if __name__ == "__main__":
    # Small shapes consistent with the module's forward signature.
    B, H, N, E, K = 2, 32, 8, 16, 32   # batch, hidden_dim, n_items, item_emb_dim, key_dim

    root = jax.random.PRNGKey(0)
    k_hidden, k_items, k_wq, k_wk, k_wv = jax.random.split(root, 5)

    hidden = jax.random.normal(k_hidden, (B, H), dtype=jnp.float32)
    items_emb = jax.random.normal(k_items, (B, N, E), dtype=jnp.float32)

    # Deterministic "parameters" (PyTorch Linear weight layout: (out, in)).
    wq = jax.random.normal(k_wq, (K, H), dtype=jnp.float32) * (H ** -0.5)
    wk = jax.random.normal(k_wk, (K, E), dtype=jnp.float32) * (E ** -0.5)
    wv = jax.random.normal(k_wv, (1, E), dtype=jnp.float32) * (E ** -0.5)

    out = inv_attn(hidden, items_emb, wq, wk, wv, key_dim=K)
    out = jax.block_until_ready(out)

    ref = _reference(hidden, items_emb, wq, wk, wv, key_dim=K)
    assert out.shape == (B, N)
    assert jnp.allclose(out, ref, atol=1e-4, rtol=1e-4), "mismatch vs reference"

    print("KERNEL_OK")
</pallas_src>

<mosaic_0001>
module attributes {stable_mosaic.version = 11 : i64} {
  func.func @_inv_attn_kernel(%arg0: memref<2x32xf32, #tpu.memory_space<vmem>>, %arg1: memref<2x8x16xf32, #tpu.memory_space<vmem>>, %arg2: memref<32x32xf32, #tpu.memory_space<vmem>>, %arg3: memref<32x16xf32, #tpu.memory_space<vmem>>, %arg4: memref<1x16xf32, #tpu.memory_space<vmem>>, %arg5: memref<2x8xf32, #tpu.memory_space<vmem>>) attributes {dimension_semantics = [], scalar_prefetch = 0 : i64, scratch_operands = 0 : i64, tpu.core_type = #tpu.core_type<tc>} {
    %c0 = arith.constant 0 : index
    %c0_0 = arith.constant 0 : index
    %0 = vector.load %arg0[%c0, %c0_0] : memref<2x32xf32, #tpu.memory_space<vmem>>, vector<2x32xf32>
    %c0_1 = arith.constant 0 : index
    %c0_2 = arith.constant 0 : index
    %c0_3 = arith.constant 0 : index
    %1 = vector.load %arg1[%c0_1, %c0_2, %c0_3] : memref<2x8x16xf32, #tpu.memory_space<vmem>>, vector<2x8x16xf32>
    %c0_4 = arith.constant 0 : index
    %c0_5 = arith.constant 0 : index
    %2 = vector.load %arg2[%c0_4, %c0_5] : memref<32x32xf32, #tpu.memory_space<vmem>>, vector<32x32xf32>
    %c0_6 = arith.constant 0 : index
    %c0_7 = arith.constant 0 : index
    %3 = vector.load %arg3[%c0_6, %c0_7] : memref<32x16xf32, #tpu.memory_space<vmem>>, vector<32x16xf32>
    %c0_8 = arith.constant 0 : index
    %c0_9 = arith.constant 0 : index
    %4 = vector.load %arg4[%c0_8, %c0_9] : memref<1x16xf32, #tpu.memory_space<vmem>>, vector<1x16xf32>
    %cst = arith.constant dense<0.000000e+00> : vector<2x32xf32>
    %5 = tpu.matmul %0, %2, %cst {dimension_numbers = #tpu.dot_dimension_numbers<[1], [1], [0], [0], [0, 0, 1, 0], [], []>} : vector<2x32xf32>, vector<32x32xf32>, vector<2x32xf32> -> vector<2x32xf32>
    %cst_10 = arith.constant dense<0.000000e+00> : vector<2x16xf32>
    %6 = tpu.matmul %5, %3, %cst_10 {dimension_numbers = #tpu.dot_dimension_numbers<[1], [0], [0], [1], [0, 0, 1, 1], [], []>} : vector<2x32xf32>, vector<32x16xf32>, vector<2x16xf32> -> vector<2x16xf32>
    %cst_11 = arith.constant 0.176776692 : f32
    %7 = vector.broadcast %cst_11 : f32 to vector<2x16xf32>
    %8 = arith.mulf %6, %7 : vector<2x16xf32>
    %9 = vector.shape_cast %8 : vector<2x16xf32> to vector<2x1x16xf32>
    %10 = vector.broadcast %9 : vector<2x1x16xf32> to vector<2x8x16xf32>
    %11 = arith.mulf %1, %10 : vector<2x8x16xf32>
    %cst_12 = arith.constant dense<0.000000e+00> : vector<2x8xf32>
    %12 = vector.multi_reduction <add>, %11, %cst_12 [2] : vector<2x8x16xf32> to vector<2x8xf32>
    %13 = vector.shape_cast %4 : vector<1x16xf32> to vector<1x1x16xf32>
    %14 = vector.broadcast %13 : vector<1x1x16xf32> to vector<2x8x16xf32>
    %15 = arith.mulf %1, %14 : vector<2x8x16xf32>
    %cst_13 = arith.constant dense<0.000000e+00> : vector<2x8xf32>
    %16 = vector.multi_reduction <add>, %15, %cst_13 [2] : vector<2x8x16xf32> to vector<2x8xf32>
    %17 = arith.mulf %12, %16 : vector<2x8xf32>
    %c0_14 = arith.constant 0 : index
    %c0_15 = arith.constant 0 : index
    %18 = vector.load %arg5[%c0_14, %c0_15] : memref<2x8xf32, #tpu.memory_space<vmem>>, vector<2x8xf32>
    tpu.vector_store %arg5[%c0_14, %c0_15], %17 {strides = array<i32>} : memref<2x8xf32, #tpu.memory_space<vmem>>, vector<2x8xf32>,
    return
  }
}

</mosaic_0001>

<bundles_post_ra>
// kernel: tpu_custom_call.1
= control target key start
LH: loop header
LB: loop body
LE: loop exit
PB: predicated region body
PF: predicated region fallthrough
CT: control target
= control target key end

     0   :  { %vm33_vm0 = vcmask 261120   ;;  %v347_v1 = vmov 0.0   ;;  %vm348_vm1 = vmmov 0   ;;  %s430_s0 = inlined_call_operand.vmem [shape: f32[2,32], index: 0, kind: input, shape index: {}]   ;;  %s431_s1 = inlined_call_operand.vmem [shape: f32[2,8,16], index: 1, kind: input, shape index: {}]   ;;  %s432_s2 = inlined_call_operand.vmem [shape: f32[32,32], index: 2, kind: input, shape index: {}]   ;;  %s433_s3 = inlined_call_operand.vmem [shape: f32[32,16], index: 3, kind: input, shape index: {}]   ;;  %s434_s4 = inlined_call_operand.vmem [shape: f32[1,16], index: 4, kind: input, shape index: {}]   ;;  %s435_s5 = inlined_call_operand.hbm [shape: f32[2,8], index: 5, kind: output, shape index: {}]  }
   0x1   :  { %v27_v0 = vld [vmem:[%s432_s2 + $0x18] sm:$0xff]  ;;  %299 = vmatprep.subr.mxu0 %v347_v1  ;;  %307 = vmatprep.mubr.msk.f32.mxu0 %vm348_vm1, %v347_v1  ;;  %v30_v3 = vld [vmem:[%s433_s3 + $0x10] sm:$0xff] }
   0x2   :  { %v31_v2 = vld [vmem:[%s433_s3 + $0x18] sm:$0xff]  ;;  %300 = vmatpush3.xpose.msk.msra.mxu0 %vm33_vm0, %v27_v0  ;;  %310 = vmatprep.subr.mxu1 %v347_v1 }
   0x3   :  { %10 = vsyncpa [#allocation3], 0  ;;  %301 = vmatprep.subr.mxu0 %v347_v1  ;;  %v26_v4 = vld [vmem:[%s432_s2 + $0x10] sm:$0xff]  ;;  %311 = vmatpush3.msra.mxu1 %v31_v2  ;;  %v29_v5 = vld [vmem:[%s433_s3 + $0x8] sm:$0xff]  ;;  %vm228_vm2 = vcmask 130048   ;;  %v197_v18 = vlaneseq  ;;  %vm263_vm3 = vcmask 1041409  }
   0x4   :  { %312 = vmatprep.subr.mxu1 %v347_v1  ;;  %318 = vmatprep.mubr.msk.f32.mxu1 %vm348_vm1, %v347_v1  ;;  %v25_v6 = vld [vmem:[%s432_s2 + $0x8] sm:$0xff]  ;;  %v24_v7 = vld [vmem:[%s432_s2] sm:$0xff]  ;;  %v349_v23 = vmov 1966171168   ;;  %vm266_vm4 = vcmask 58368  }
   0x5   :  { %313 = vmatpush3.msra.mxu1 %v30_v3  ;;  %v21_v8 = vld [vmem:[%s430_s0] sm:$0x3]  ;;  %v23_v16 = vld [vmem:[%s431_s1 + $0x8] sm:$0xff]  ;;  %v198_v20 = vshrl.u32 %v197_v18, 7  ;;  %v254_v21 = vand.u32 127, %v197_v18  ;;  %v195_v24 = vunpack.c.l.s4 %v349_v23 }
   0x6   :  { %302 = vmatpush3.xpose.msk.msra.mxu0 %vm33_vm0, %v26_v4  ;;  %314 = vmatprep.subr.mxu1 %v347_v1  ;;  %v28_v9 = vld [vmem:[%s433_s3] sm:$0xff] }
   0x7   :  { %303 = vmatprep.subr.mxu0 %v347_v1  ;;  %315 = vmatpush3.msra.mxu1 %v29_v5  ;;  %v22_v12 = vld [vmem:[%s431_s1] sm:$0xff]  ;;  %v257_v22 = vsub.s32 %v254_v21, %v198_v20  ;;  %v196_v25 = vunpack.c.0.s8 %v195_v24  ;;  %v218_v31 = vsub.s32 0, %v198_v20  ;;  %s350_s1 = smov [#allocation2]  }
   0x8   :  { %316 = vmatprep.subr.mxu1 %v347_v1  ;;  %v288_v13 = vld [vmem:[%s434_s4] ss:$0 sm:$0xff]  ;;  %s274_s4 = sshll.u32 %s350_s1, 4  ;;  %s275_s4 = int_to_ptr.vmem [resolvable:$true] %s274_s4 }
   0x9   :  { %317 = vmatpush3.msra.mxu1 %v28_v9  ;;  %v241_v14 = vmul.f32 %v288_v13, %v22_v12  ;;  %v242_v17 = vmul.f32 %v288_v13, %v23_v16  ;;  %v199_v26 = vsub.s32 %v196_v25, %v198_v20  ;;  %s325_s14 = scalar_lea.vmem %s275_s4, 32  ;;  %p330_p1 = scmp.lt.s32.totalorder %s275_s4, %s275_s4 }
   0xa   :  { %304 = vmatpush3.xpose.msk.msra.mxu0 %vm33_vm0, %v25_v6  ;;  %p326_p0 = scmp.ne.s32.totalorder %s275_s4, %s325_s14  ;;  %p331_p2 = scmp.lt.s32.totalorder %s325_s14, %s325_s14 }
   0xb   :  { %305 = vmatprep.subr.mxu0 %v347_v1  ;;  %v243_v15 = vsel %vm228_vm2, %v241_v14, 0.0  ;;  %v246_v19 = vsel %vm228_vm2, %v242_v17, 0.0 }
   0xc   :  { %244 = vadd.xlane.f32.xlu1 %v243_v15  ;;  %p332_p3 = por %p331_p2, %p330_p1 }
   0xe   :  { %306 = vmatpush3.xpose.msk.msra.mxu0 %vm33_vm0, %v24_v7  ;;  %p333_p4 = pnand %p332_p3, %p326_p0 }
  0x10   :  { %247 = vadd.xlane.f32.xlu1 %v246_v19 }
  0x11   :  { %308 = vmatmul.mubr.msk.f32.vlgmr.msra.gmra.mxu0 %vm33_vm0, %v21_v8 }
  0x95   :  { %v245_v41 = vpop.xlane.xlu1 %244 }
  0x99   :  { %v248_v43 = vpop.xlane.xlu1 %247 }
  0xd1   :  { %v115_v10 = vpop.f32.mrf.mxu0 }
  0xd2   :  { %319 = vmatmul.mubr.msk.f32.vlgmr.msra.gmra.mxu1 %vm33_vm0, %v115_v10 }
  0xd3   :  { %v309_v11 = vpop.f32.mrf.mxu0 }
 0x192   :  { %v188_v27 = vpop.f32.mrf.mxu1 }
 0x193   :  { %v192_v28 = vmul.f32 0.17677669, %v188_v27 }
 0x194   :  { %v320_v29 = vpop.f32.mrf.mxu1 }
 0x195   :  { %v200_v30 = vrot.slane %v192_v28, %v199_v26 }
 0x197   :  { %v201_v32 = vcombine.high %v200_v30, %v200_v30  ;;  %v208_v33 = vrot.slane %v200_v30, %v199_v26 }
 0x199   :  { %v219_v34 = vrot.slane %v208_v33, %v218_v31  ;;  %v215_v35 = vrot.slane %v201_v32, %v199_v26 }
 0x19b   :  { %v226_v36 = vmul.f32 %v219_v34, %v22_v12  ;;  %v223_v37 = vrot.slane %v215_v35, %v218_v31 }
 0x19d   :  { %v229_v38 = vsel %vm228_vm2, %v226_v36, 0.0  ;;  %v227_v39 = vmul.f32 %v223_v37, %v23_v16 }
 0x19e   :  { %230 = vadd.xlane.f32.xlu0 %v229_v38 }
 0x19f   :  { %v232_v40 = vsel %vm228_vm2, %v227_v39, 0.0 }
 0x1a2   :  { %233 = vadd.xlane.f32.xlu0 %v232_v40 }
 0x227   :  { %v231_v42 = vpop.xlane.xlu0 %230 }
 0x228   :  { %v249_v44 = vmul.f32 %v245_v41, %v231_v42 }
 0x22a   :  { %v258_v47 = vrot.slane %v249_v44, %v257_v22 }
 0x22b   :  { %v234_v45 = vpop.xlane.xlu0 %233 }
 0x22c   :  { %v250_v46 = vmul.f32 %v248_v43, %v234_v45 }
 0x22e   :  { %v262_v48 = vrot.slane %v250_v46, %v257_v22 }
 0x230   :  { %v264_v49 = vsel %vm263_vm3, %v262_v48, %v258_v47 }
 0x231   :  { %267 = vst.msk [vmem:[#allocation2] sm:$0x3] %vm266_vm4, %v264_v49 }
 0x232   :  { %336 = shalt.err (!%p333_p4)
}
 0x233   :  { %277 = dma.vmem_to_hbm [thread:$0]  %s275_s4, 32, %s435_s5, [#allocation3]  }
 0x234   :  { %345 = dma.done.wait [#allocation3], 32  }
 0x235   :  { %346 = vsyncadd [#allocation3], 4294967264 }
 0x236   :  { %281 = vsyncpa [#allocation3], 1 }

</bundles_post_ra>
